<compile_context>
chip_gen: v7x
topology: tpu7x:2x2x1
jax: 0.10.0
libtpu: 0.0.40
codegen_flags: <defaults>
</compile_context>

<pallas_src>
import functools

import jax
import jax.numpy as jnp
from jax import lax
from jax.experimental import pallas as pl
from jax.experimental.pallas import tpu as pltpu

# ---- module hyper-parameters (from the PyTorch source) ----
N_EMBED = 384
NUM_HEADS = 6
HEAD_SIZE = N_EMBED // NUM_HEADS  # 64
BLOCK_SIZE = 256                  # max sequence length (causal mask buffer size)

_NEG_BIG = -1.0e30                # finite "minus infinity" for masking (NaN-proof)


# ----------------------------------------------------------------------------
# Fused kernel: one (batch, head) step; projection accumulated into the output.
# ----------------------------------------------------------------------------
def _mha_head_kernel(xh_ref, wqkv_ref, wprojh_ref, bproj_ref, o_ref, *, head_size):
    """Grid=(B, H). Ref shapes (squeezed dims dropped by BlockSpec):
         xh_ref     : (T, C)      bf16 per-(head,batch) Gaussian 'input' noise
         wqkv_ref   : (C, 3*hs)   bf16 fused q/k/v weights (q cols pre-scaled by C**-0.5)
         wprojh_ref : (hs, C)     bf16 slice of the output projection for this head
         bproj_ref  : (1, C)      f32 output projection bias
         o_ref      : (T, C)      f32 result block; doubles as the accumulator
                                  (same block index across the head axis).
    """
    hs = head_size
    h = pl.program_id(1)
    t = xh_ref.shape[0]

    @pl.when(h == 0)
    def _():
        # initialize the resident output block with the projection bias
        o_ref[...] = jnp.broadcast_to(bproj_ref[...], o_ref.shape)

    x = xh_ref[...]                                   # (T, C) bf16
    w = wqkv_ref[...]                                 # (C, 3*hs) bf16, scale folded in q cols
    qkv = jnp.dot(x, w, preferred_element_type=jnp.float32)   # (T, 3*hs) f32

    q = qkv[:, :hs].astype(jnp.bfloat16)              # (T, hs)
    k = qkv[:, hs:2 * hs].astype(jnp.bfloat16)
    v = qkv[:, 2 * hs:].astype(jnp.bfloat16)

    # scores = q @ k^T, contracting last dims directly (no transposed copy of k).
    s = lax.dot_general(q, k, (((1,), (1,)), ((), ())),
                        preferred_element_type=jnp.float32)    # (T, T) f32

    row = lax.broadcasted_iota(jnp.int32, (t, t), 0)
    col = lax.broadcasted_iota(jnp.int32, (t, t), 1)
    s = jnp.where(col <= row, s, _NEG_BIG)                     # causal mask

    s = s - jnp.max(s, axis=-1, keepdims=True)                 # stable softmax (f32)
    p = jnp.exp(s)
    p = p * pl.reciprocal(jnp.sum(p, axis=-1, keepdims=True), approx=True)

    head_out = jnp.dot(p.astype(jnp.bfloat16), v,
                       preferred_element_type=jnp.float32)     # (T, hs) f32

    # per-head slice of the output projection, accumulated into the (T, 384) block:
    # lane-dense N=384 MXU output, no (T, 64) concat relayout, short live ranges.
    o_ref[...] += jnp.dot(head_out.astype(jnp.bfloat16), wprojh_ref[...],
                          preferred_element_type=jnp.float32)


def multihead_attention_forward(x, params, *, noise_key):
    """x: (B, T, C). Returns (B, T, C) float32."""
    B, T, C = x.shape
    H, _, three_hs = params["wqkv"].shape
    hs = three_hs // 3
    assert H * hs == C

    # Each Head discards the real input and draws fresh Gaussian noise
    # (faithful to `x = torch.randn(B, T, C)` in the reference forward).
    # Drawn directly in bf16: it is only ever used as a bf16 MXU operand, and this
    # halves the dominant HBM read stream.
    x_heads = jax.random.normal(noise_key, (H, B, T, C), dtype=jnp.bfloat16)

    kernel = functools.partial(_mha_head_kernel, head_size=hs)

    return pl.pallas_call(
        kernel,
        out_shape=jax.ShapeDtypeStruct((B, T, C), jnp.float32),
        grid_spec=pltpu.PrefetchScalarGridSpec(
            num_scalar_prefetch=0,
            grid=(B, H),   # batch (parallel) x head (reduction, last by convention)
            in_specs=[
                # per-(head, batch) noise block; head & batch dims squeezed.
                pl.BlockSpec((None, None, T, C), lambda b, h: (h, b, 0, 0)),
                # fused q/k/v weights for this head (bf16, q cols pre-scaled).
                pl.BlockSpec((None, C, three_hs), lambda b, h: (h, 0, 0)),
                # rows [h*hs : (h+1)*hs) of the output projection (block index = h).
                pl.BlockSpec((hs, C), lambda b, h: (h, 0)),
                # projection bias (f32), resident.
                pl.BlockSpec((1, C), lambda b, h: (0, 0)),
            ],
            # same output block across the head axis -> resident accumulator.
            out_specs=pl.BlockSpec((None, T, C), lambda b, h: (b, 0, 0)),
        ),
        compiler_params=pltpu.CompilerParams(
            # batch shards across TensorCores (megacore on v6e, 2 TCs on v7x);
            # head axis is a reduction into the resident output block.
            dimension_semantics=("parallel", "arbitrary")),
    )(x_heads, params["wqkv"], params["w_proj_t"], params["b_proj"])


# ----------------------------------------------------------------------------
# Parameter init (PyTorch Linear-style U(-1/sqrt(in), 1/sqrt(in))), q/k/v fused,
# pre-cast to bf16, attention scale folded into the q columns (one-time).
# ----------------------------------------------------------------------------
def init_params(key):
    ks = jax.random.split(key, 5)
    bound = 1.0 / (N_EMBED ** 0.5)
    scale = float(N_EMBED) ** -0.5        # C ** -0.5, exactly as the PyTorch source
    wq = jax.random.uniform(ks[0], (NUM_HEADS, N_EMBED, HEAD_SIZE),
                            minval=-bound, maxval=bound, dtype=jnp.float32)
    wk = jax.random.uniform(ks[1], (NUM_HEADS, N_EMBED, HEAD_SIZE),
                            minval=-bound, maxval=bound, dtype=jnp.float32)
    wv = jax.random.uniform(ks[2], (NUM_HEADS, N_EMBED, HEAD_SIZE),
                            minval=-bound, maxval=bound, dtype=jnp.float32)
    # fold the attention scale into q's weights, then one-time bf16 cast.
    wqkv = jnp.concatenate([wq * scale, wk, wv], axis=-1).astype(jnp.bfloat16)
    # proj: Linear(n_embed, n_embed) with bias; stored already transposed (in, out), bf16.
    w_proj_t = jax.random.uniform(ks[3], (N_EMBED, N_EMBED),
                                  minval=-bound, maxval=bound,
                                  dtype=jnp.float32).astype(jnp.bfloat16)
    b_proj = jax.random.uniform(ks[4], (1, N_EMBED),
                                minval=-bound, maxval=bound, dtype=jnp.float32)
    return dict(wqkv=wqkv, w_proj_t=w_proj_t, b_proj=b_proj)


# ----------------------------------------------------------------------------
# Pure-JAX reference (f32 compute on the SAME bf16 noise/weights) for checking.
# ----------------------------------------------------------------------------
def _reference_forward(x, params, noise_key):
    B, T, C = x.shape
    wqkv = params["wqkv"].astype(jnp.float32)          # q cols already scaled
    H, _, three_hs = wqkv.shape
    hs = three_hs // 3
    xh = jax.random.normal(noise_key, (H, B, T, C),
                           dtype=jnp.bfloat16).astype(jnp.float32)
    q = jnp.einsum("hbtc,hcd->hbtd", xh, wqkv[..., :hs])
    k = jnp.einsum("hbtc,hcd->hbtd", xh, wqkv[..., hs:2 * hs])
    v = jnp.einsum("hbtc,hcd->hbtd", xh, wqkv[..., 2 * hs:])
    wei = jnp.einsum("hbtd,hbsd->hbts", q, k)           # scale already folded in
    mask = jnp.tril(jnp.ones((T, T), dtype=bool))
    wei = jnp.where(mask, wei, -jnp.inf)
    wei = jax.nn.softmax(wei, axis=-1)
    out = jnp.einsum("hbts,hbsd->hbtd", wei, v)          # (H, B, T, hs)
    stack = jnp.transpose(out, (1, 2, 0, 3)).reshape(B, T, H * hs)
    return stack @ params["w_proj_t"].astype(jnp.float32) + params["b_proj"][0]


if __name__ == "__main__":
    key = jax.random.PRNGKey(0)
    k_param, k_x, k_noise = jax.random.split(key, 3)

    B, T = 2, 16                       # small example shapes; T <= block_size
    x = jax.random.normal(k_x, (B, T, N_EMBED), dtype=jnp.float32)
    params = init_params(k_param)

    out = jax.block_until_ready(
        multihead_attention_forward(x, params, noise_key=k_noise))

    ref = _reference_forward(x, params, k_noise)
    assert out.shape == (B, T, N_EMBED)
    # bf16 MXU operands + approx reciprocal vs an f32-compute reference -> loosened tolerance.
    assert jnp.allclose(out, ref, atol=2e-2, rtol=2e-2), "mismatch vs JAX reference"

    print("KERNEL_OK")
</pallas_src>

<mosaic_0001>
module attributes {stable_mosaic.version = 11 : i64} {
  func.func @_mha_head_kernel(%arg0: i32, %arg1: i32, %arg2: memref<1x1x16x384xbf16, #tpu.memory_space<vmem>>, %arg3: memref<1x384x192xbf16, #tpu.memory_space<vmem>>, %arg4: memref<64x384xbf16, #tpu.memory_space<vmem>>, %arg5: memref<1x384xf32, #tpu.memory_space<vmem>>, %arg6: memref<1x16x384xf32, #tpu.memory_space<vmem>>) attributes {dimension_semantics = [#tpu.dimension_semantics<parallel>, #tpu.dimension_semantics<arbitrary>], iteration_bounds = array<i64: 2, 6>, scalar_prefetch = 0 : i64, scratch_operands = 0 : i64, tpu.core_type = #tpu.core_type<tc>, window_params = [{transform_indices = @transform_0, window_bounds = array<i64: 1, 1, 16, 384>}, {transform_indices = @transform_1, window_bounds = array<i64: 1, 384, 192>}, {transform_indices = @transform_2, window_bounds = array<i64: 64, 384>}, {pipeline_mode = #tpu.pipeline_mode<synchronous>, transform_indices = @transform_3, window_bounds = array<i64: 1, 384>}, {transform_indices = @transform_4, window_bounds = array<i64: 1, 16, 384>}]} {
    %c0_i32 = arith.constant 0 : i32
    %0 = arith.cmpi eq, %arg1, %c0_i32 : i32
    %1 = arith.extui %0 : i1 to i32
    %c0_i32_0 = arith.constant 0 : i32
    %2 = arith.cmpi ne, %1, %c0_i32_0 : i32
    scf.if %2 {
      %c0_21 = arith.constant 0 : index
      %c0_22 = arith.constant 0 : index
      %41 = vector.load %arg5[%c0_21, %c0_22] : memref<1x384xf32, #tpu.memory_space<vmem>>, vector<1x384xf32>
      %42 = vector.shape_cast %41 : vector<1x384xf32> to vector<1x384xf32>
      %43 = vector.broadcast %42 : vector<1x384xf32> to vector<16x384xf32>
      %c0_23 = arith.constant 0 : index
      %c0_24 = arith.constant 0 : index
      %c0_25 = arith.constant 0 : index
      %44 = vector.load %arg6[%c0_23, %c0_24, %c0_25] : memref<1x16x384xf32, #tpu.memory_space<vmem>>, vector<1x16x384xf32>
      %45 = vector.shape_cast %44 : vector<1x16x384xf32> to vector<16x384xf32>
      %46 = vector.shape_cast %43 : vector<16x384xf32> to vector<1x16x384xf32>
      tpu.vector_store %arg6[%c0_23, %c0_24, %c0_25], %46 {strides = array<i32>} : memref<1x16x384xf32, #tpu.memory_space<vmem>>, vector<1x16x384xf32>,
    } else {
    }
    %c0 = arith.constant 0 : index
    %c0_1 = arith.constant 0 : index
    %c0_2 = arith.constant 0 : index
    %c0_3 = arith.constant 0 : index
    %3 = vector.load %arg2[%c0, %c0_1, %c0_2, %c0_3] : memref<1x1x16x384xbf16, #tpu.memory_space<vmem>>, vector<1x1x16x384xbf16>
    %4 = vector.shape_cast %3 : vector<1x1x16x384xbf16> to vector<16x384xbf16>
    %c0_4 = arith.constant 0 : index
    %c0_5 = arith.constant 0 : index
    %c0_6 = arith.constant 0 : index
    %5 = vector.load %arg3[%c0_4, %c0_5, %c0_6] : memref<1x384x192xbf16, #tpu.memory_space<vmem>>, vector<1x384x192xbf16>
    %6 = vector.shape_cast %5 : vector<1x384x192xbf16> to vector<384x192xbf16>
    %cst = arith.constant dense<0.000000e+00> : vector<16x192xf32>
    %7 = tpu.matmul %4, %6, %cst {dimension_numbers = #tpu.dot_dimension_numbers<[1], [0], [0], [1], [0, 0, 1, 1], [], []>} : vector<16x384xbf16>, vector<384x192xbf16>, vector<16x192xf32> -> vector<16x192xf32>
    %8 = vector.extract_strided_slice %7 {offsets = [0, 0], sizes = [16, 64], strides = [1, 1]} : vector<16x192xf32> to vector<16x64xf32>
    %9 = arith.truncf %8 : vector<16x64xf32> to vector<16x64xbf16>
    %10 = vector.extract_strided_slice %7 {offsets = [0, 64], sizes = [16, 64], strides = [1, 1]} : vector<16x192xf32> to vector<16x64xf32>
    %11 = arith.truncf %10 : vector<16x64xf32> to vector<16x64xbf16>
    %12 = vector.extract_strided_slice %7 {offsets = [0, 128], sizes = [16, 64], strides = [1, 1]} : vector<16x192xf32> to vector<16x64xf32>
    %13 = arith.truncf %12 : vector<16x64xf32> to vector<16x64xbf16>
    %cst_7 = arith.constant dense<0.000000e+00> : vector<16x16xf32>
    %14 = tpu.matmul %9, %11, %cst_7 {dimension_numbers = #tpu.dot_dimension_numbers<[1], [1], [0], [0], [0, 0, 1, 0], [], []>} : vector<16x64xbf16>, vector<16x64xbf16>, vector<16x16xf32> -> vector<16x16xf32>
    %15 = tpu.iota {dimensions = array<i32: 0>} : vector<16x16xi32>
    %16 = tpu.iota {dimensions = array<i32: 1>} : vector<16x16xi32>
    %17 = arith.cmpi sle, %16, %15 : vector<16x16xi32>
    %cst_8 = arith.constant -1.000000e+30 : f32
    %18 = vector.broadcast %cst_8 : f32 to vector<16x16xf32>
    %19 = arith.select %17, %14, %18 : vector<16x16xi1>, vector<16x16xf32>
    %cst_9 = arith.constant dense<0xFF800000> : vector<16xf32>
    %20 = vector.multi_reduction <maximumf>, %19, %cst_9 [1] : vector<16x16xf32> to vector<16xf32>
    %21 = vector.shape_cast %20 : vector<16xf32> to vector<16x1xf32>
    %22 = vector.broadcast %21 : vector<16x1xf32> to vector<16x16xf32>
    %23 = arith.subf %19, %22 : vector<16x16xf32>
    %24 = math.exp %23 : vector<16x16xf32>
    %cst_10 = arith.constant dense<0.000000e+00> : vector<16xf32>
    %25 = vector.multi_reduction <add>, %24, %cst_10 [1] : vector<16x16xf32> to vector<16xf32>
    %26 = vector.shape_cast %25 : vector<16xf32> to vector<16x1xf32>
    %27 = tpu.reciprocal %26 {approx = true} : vector<16x1xf32> -> vector<16x1xf32>
    %28 = vector.broadcast %27 : vector<16x1xf32> to vector<16x16xf32>
    %29 = arith.mulf %24, %28 : vector<16x16xf32>
    %30 = arith.truncf %29 : vector<16x16xf32> to vector<16x16xbf16>
    %cst_11 = arith.constant dense<0.000000e+00> : vector<16x64xf32>
    %31 = tpu.matmul %30, %13, %cst_11 {dimension_numbers = #tpu.dot_dimension_numbers<[1], [0], [0], [1], [0, 0, 1, 1], [], []>} : vector<16x16xbf16>, vector<16x64xbf16>, vector<16x64xf32> -> vector<16x64xf32>
    %c0_12 = arith.constant 0 : index
    %c0_13 = arith.constant 0 : index
    %c0_14 = arith.constant 0 : index
    %32 = vector.load %arg6[%c0_12, %c0_13, %c0_14] : memref<1x16x384xf32, #tpu.memory_space<vmem>>, vector<1x16x384xf32>
    %33 = vector.shape_cast %32 : vector<1x16x384xf32> to vector<16x384xf32>
    %34 = arith.truncf %31 : vector<16x64xf32> to vector<16x64xbf16>
    %c0_15 = arith.constant 0 : index
    %c0_16 = arith.constant 0 : index
    %35 = vector.load %arg4[%c0_15, %c0_16] : memref<64x384xbf16, #tpu.memory_space<vmem>>, vector<64x384xbf16>
    %cst_17 = arith.constant dense<0.000000e+00> : vector<16x384xf32>
    %36 = tpu.matmul %34, %35, %cst_17 {dimension_numbers = #tpu.dot_dimension_numbers<[1], [0], [0], [1], [0, 0, 1, 1], [], []>} : vector<16x64xbf16>, vector<64x384xbf16>, vector<16x384xf32> -> vector<16x384xf32>
    %37 = arith.addf %33, %36 : vector<16x384xf32>
    %c0_18 = arith.constant 0 : index
    %c0_19 = arith.constant 0 : index
    %c0_20 = arith.constant 0 : index
    %38 = vector.load %arg6[%c0_18, %c0_19, %c0_20] : memref<1x16x384xf32, #tpu.memory_space<vmem>>, vector<1x16x384xf32>
    %39 = vector.shape_cast %38 : vector<1x16x384xf32> to vector<16x384xf32>
    %40 = vector.shape_cast %37 : vector<16x384xf32> to vector<1x16x384xf32>
    tpu.vector_store %arg6[%c0_18, %c0_19, %c0_20], %40 {strides = array<i32>} : memref<1x16x384xf32, #tpu.memory_space<vmem>>, vector<1x16x384xf32>,
    return
  }
  func.func @transform_0(%arg0: i32, %arg1: i32) -> (i32, i32, i32, i32) {
    %c0_i32 = arith.constant 0 : i32
    %c0_i32_0 = arith.constant 0 : i32
    %c0_i32_1 = arith.constant 0 : i32
    return %arg1, %arg0, %c0_i32, %c0_i32_0 : i32, i32, i32, i32
  }
  func.func @transform_1(%arg0: i32, %arg1: i32) -> (i32, i32, i32) {
    %c0_i32 = arith.constant 0 : i32
    %c0_i32_0 = arith.constant 0 : i32
    %c0_i32_1 = arith.constant 0 : i32
    return %arg1, %c0_i32, %c0_i32_0 : i32, i32, i32
  }
  func.func @transform_2(%arg0: i32, %arg1: i32) -> (i32, i32) {
    %c0_i32 = arith.constant 0 : i32
    %c0_i32_0 = arith.constant 0 : i32
    return %arg1, %c0_i32 : i32, i32
  }
  func.func @transform_3(%arg0: i32, %arg1: i32) -> (i32, i32) {
    %c0_i32 = arith.constant 0 : i32
    %c0_i32_0 = arith.constant 0 : i32
    %c0_i32_1 = arith.constant 0 : i32
    return %c0_i32, %c0_i32_0 : i32, i32
  }
  func.func @transform_4(%arg0: i32, %arg1: i32) -> (i32, i32, i32) {
    %c0_i32 = arith.constant 0 : i32
    %c0_i32_0 = arith.constant 0 : i32
    %c0_i32_1 = arith.constant 0 : i32
    return %arg0, %c0_i32, %c0_i32_0 : i32, i32, i32
  }
}

</mosaic_0001>

<bundles_post_ra>
// kernel: tpu_custom_call.1
= control target key start
LH: loop header
LB: loop body
LE: loop exit
PB: predicated region body
PF: predicated region fallthrough
CT: control target
= control target key end

     0   :  { %9 = vsyncpa [#allocation3], 0  ;;  %s1818_s0 = inlined_call_operand.vmem [shape: bf16[6,2,16,384], index: 0, kind: input, shape index: {}]   ;;  %s1819_s1 = inlined_call_operand.vmem [shape: bf16[6,384,192], index: 1, kind: input, shape index: {}]   ;;  %s1820_s2 = inlined_call_operand.vmem [shape: bf16[384,384], index: 2, kind: input, shape index: {}]   ;;  %s1821_s3 = inlined_call_operand.vmem [shape: f32[1,384], index: 3, kind: input, shape index: {}]   ;;  %s1822_s4 = inlined_call_operand.hbm [shape: f32[2,16,384], index: 4, kind: output, shape index: {}]  }
   0x1   :  { %11 = vsyncpa [#allocation3 + $0x1], 0  ;;  %s1553_s15 = smov 0   ;;  %s1555_s16 = smov 0  }
   0x2   :  { %s1557_s17 = smov 0   ;;  %s1559_s18 = smov 0  }
   0x3   :  { %s1561_s19 = smov 0   ;;  %s1563_s20 = smov 0  }
   0x4   :  { %s1565_s21 = smov 0   ;;  %s1567_s22 = smov 0  }
   0x5 LB: > { %1827 = sst [smem:[#allocation5_spill]] %s1511_s20  ;;  %s1125_s23 = sadd.s32 4294967295, %s1519_s22   ;;  %s1519_s22 = sphi %s1567_s22, %s17_s22   ;;  %s1515_s21 = sphi %s1565_s21, %s1839_s21   ;;  %s1511_s20 = sphi %s1563_s20, %s1838_s20   ;;  %s1507_s19 = sphi %s1561_s19, %s1837_s19   ;;  %s1503_s18 = sphi %s1559_s18, %s1836_s18   ;;  %s1499_s17 = sphi %s1557_s17, %s1842_s17   ;;  %s1495_s16 = sphi %s1555_s16, %s1841_s16   ;;  %s1491_s15 = sphi %s1553_s15, %s1840_s15  }
   0x6   : > { %1828 = sst [smem:[#allocation6_spill]] %s1515_s21  ;;  %s1126_s24 = sadd.s32 4294967294, %s1519_s22  }
   0x7   : > { %s26_s25 = sadd.s32 1, %s1511_s20  ;;  %s29_s26 = sadd.s32 1, %s1515_s21 }
   0x8   : > { %p27_p0 = scmp.ge.s32.totalorder %s26_s25, 6  ;;  %p147_p1 = scmp.ne.s32.totalorder %s1499_s17, %s1495_s16 }
   0x9   : > { %p148_p2 = scmp.eq.s32.totalorder %s1125_s23, 11  ;;  %p153_p4 = scmp.ne.s32.totalorder %s1495_s16, %s1491_s15 }
   0xa   : > { %s1844_s25 = smov (%p27_p0, %s26_s25), 0  ;;  %s1846_s26 = smov (!%p27_p0, %s29_s26), %s1515_s21 }
   0xb   : > { %1829 = sst [smem:[#allocation7_spill]] %s1844_s25  ;;  %p1602_p3 = por %p148_p2, %p147_p1 }
   0xc   : > { %p31_p5 = scmp.ge.s32.totalorder %s1846_s26, 2  ;;  %p154_p6 = scmp.eq.s32.totalorder %s1126_s24, 11 }
   0xd   : > { %p1129_p7 = scmp.ge.s32.totalorder %s1519_s22, 1  ;;  %p205_p8 = scmp.lt.s32.totalorder %s1519_s22, 13 }
   0xe   : > { %s1848_s26 = smov (%p31_p5, %s1846_s26), 0  ;;  %p1612_p9 = por %p154_p6, %p153_p4 }
   0xf   : > { %1831 = sst [smem:[#allocation8_spill]] %s1848_s26  ;;  %p206_p10 = pnand %p1129_p7, %p205_p8 }
  0x10   : > { %s134_s29 = ssub.s32 %s1515_s21, %s1848_s26  ;;  %s137_s30 = sadd.s32 1, %s1499_s17 }
  0x11   : > { %p135_p11 = scmp.eq.s32.totalorder %s134_s29, 0  ;;  %209 = sbr.rel (%p206_p10) target bundleno = 1441 (0x5a1), region = 36 }
  0x12   : > { %s1825_s6 = sand.u32 (!%p206_p10), 1, %s1495_s16   ;;  %p246_p12 = scmp.lt.s32.totalorder (!%p206_p10), %s1503_s18, 5 }
  0x13   : > { %s1620_s5 = scalar_select %p135_p11, %s1499_s17, %s137_s30  }
  0x14   : > { %s1242_s7 = smul.u32 (!%p206_p10), 48, %s1825_s6  ;;  %p248_p13 = scmp.lt.s32.totalorder (!%p206_p10), %s1507_s19, 1 }
  0x15   : > { %1833 = sst [smem:[#allocation9_spill]] %s1620_s5  ;;  %s1132_s9 = sshll.u32 (!%p206_p10), %s1503_s18, 3 }
  0x16   : > { %p261_p0 = scmp.lt.s32.totalorder (!%p206_p10), %s1132_s9, 47  ;;  %p1134_p1 = scmp.ne.s32.totalorder (!%p206_p10), %s1503_s18, 0 }
  0x18   : > { %s247_s8 = scalar_select %p246_p12, %s1503_s18, 5 }
  0x19   : > { %s249_s10 = scalar_select %p248_p13, %s1507_s19, 1 }
  0x1a   : > { %s1244_s11 = smul.u32 12, %s247_s8  ;;  %s1850_s9 = smov (!%p261_p0, %s1132_s9), 47  ;;  %v274_v0 = vlaneseq (!%p1134_p1)  ;;  %v272_v2 = vld [vmem:[%s1821_s3] sm:$0x7] (!%p1134_p1) }
  0x1b   : > { %s1243_s12 = smul.u32 6, %s249_s10 }
  0x1c   : > { %s1245_s13 = smul.u32 384, %s247_s8  ;;  %s1645_s8 = scalar_lea.vmem [#allocation2], %s1242_s7  ;;  %v275_v1 = vshrl.u32 (!%p1134_p1), %v274_v0, 7 }
  0x1d   : > { %s252_s14 = sadd.s32 %s1244_s11, %s1243_s12  ;;  %s1246_s6 = smul.u32 12, %s1850_s9 }
  0x1e   : > { %s1130_s23 = sshll.u32 %s252_s14, 2  ;;  %s1633_s30 = scalar_lea.vmem %s1819_s1, %s1245_s13  ;;  %v276_v3 = vsub.s32 (!%p1134_p1), 0, %v275_v1  ;;  %v280_v4 = vsub.s32 (!%p1134_p1), 1, %v275_v1  ;;  %v284_v5 = vsub.s32 (!%p1134_p1), 2, %v275_v1 }
  0x1f   : > { %s1638_s21 = scalar_lea.vmem %s1818_s0, %s1130_s23  ;;  %s1643_s10 = scalar_lea.vmem %s1820_s2, %s1246_s6 }
  0x20   : > { %271 = sbr.rel (%p1134_p1) target bundleno = 39 (0x27), region = 40  ;;  %v277_v6 = vrot.slane (!%p1134_p1), %v272_v2, %v276_v3  ;;  %v281_v7 = vrot.slane (!%p1134_p1), %v272_v2, %v280_v4  ;;  %v285_v8 = vrot.slane (!%p1134_p1), %v272_v2, %v284_v5 }
  0x22   : > { %289 = vst [vmem:[%s1645_s8] sm:$0xff] (!%p1134_p1), %v277_v6  ;;  %292 = vst [vmem:[%s1645_s8 + $0x18] sm:$0xff] (!%p1134_p1), %v277_v6 }
  0x23   : > { %290 = vst [vmem:[%s1645_s8 + $0x8] sm:$0xff] (!%p1134_p1), %v281_v7  ;;  %293 = vst [vmem:[%s1645_s8 + $0x20] sm:$0xff] (!%p1134_p1), %v281_v7 }
  0x24   : > { %291 = vst [vmem:[%s1645_s8 + $0x10] sm:$0xff] (!%p1134_p1), %v285_v8  ;;  %294 = vst [vmem:[%s1645_s8 + $0x28] sm:$0xff] (!%p1134_p1), %v285_v8 }
  0x27 PF: > { %v1325_v9 = vld [vmem:[%s1633_s30 + $0x4] ss:$8 sps:$4 sm:$0xff]   ;;  %v1327_v10 = vld [vmem:[%s1633_s30] ss:$8 sps:$4 sm:$0xff]   ;;  %v1521_v11 = vmov 0   ;;  %v1522_v61 = vmov 0.0  }
  0x28   : > { %678 = vmatprep.mubr.bf16.mxu1 %v1521_v11  ;;  %603 = vmatprep.subr.bf16.mxu0 %v1325_v9  ;;  %v1328_v12 = vld [vmem:[%s1633_s30 + $0x14] ss:$8 sps:$4 sm:$0xff]   ;;  %v1330_v13 = vld [vmem:[%s1633_s30 + $0x10] ss:$8 sps:$4 sm:$0xff]   ;;  %v1331_v14 = vld [vmem:[%s1633_s30 + $0x24] ss:$8 sps:$4 sm:$0xff]  }
  0x29   : > { %604 = vmatpush1.bf16.msra.mxu0 %v1327_v10  ;;  %v1333_v15 = vld [vmem:[%s1633_s30 + $0x20] ss:$8 sps:$4 sm:$0xff]   ;;  %v1334_v16 = vld [vmem:[%s1633_s30 + $0x34] ss:$8 sps:$4 sm:$0xff]   ;;  %v1336_v17 = vld [vmem:[%s1633_s30 + $0x30] ss:$8 sps:$4 sm:$0xff]  }
  0x2a   : > { %605 = vmatprep.subr.bf16.mxu0 %v1328_v12  ;;  %v1349_v18 = vld [vmem:[%s1633_s30 + $0x104] ss:$8 sps:$4 sm:$0xff]   ;;  %v1351_v19 = vld [vmem:[%s1633_s30 + $0x100] ss:$8 sps:$4 sm:$0xff]   ;;  %v1355_v21 = vld [vmem:[%s1633_s30 + $0x114] ss:$8 sps:$4 sm:$0xff]  }
  0x2b   : > { %v1337_v20 = vld [vmem:[%s1633_s30 + $0x44] ss:$8 sps:$4 sm:$0xff]   ;;  %646 = vmatprep.subr.bf16.mxu1 %v1349_v18  ;;  %v1357_v22 = vld [vmem:[%s1633_s30 + $0x110] ss:$8 sps:$4 sm:$0xff]   ;;  %v1339_v23 = vld [vmem:[%s1633_s30 + $0x40] ss:$8 sps:$4 sm:$0xff]  }
  0x2c   : > { %647 = vmatpush1.bf16.msra.mxu1 %v1351_v19  ;;  %v1340_v24 = vld [vmem:[%s1633_s30 + $0x54] ss:$8 sps:$4 sm:$0xff]   ;;  %v1361_v25 = vld [vmem:[%s1633_s30 + $0x124] ss:$8 sps:$4 sm:$0xff]   ;;  %v1363_v26 = vld [vmem:[%s1633_s30 + $0x120] ss:$8 sps:$4 sm:$0xff]  }
  0x2d   : > { %606 = vmatpush1.bf16.msra.mxu0 %v1330_v13  ;;  %648 = vmatprep.subr.bf16.mxu1 %v1355_v21  ;;  %v1342_v27 = vld [vmem:[%s1633_s30 + $0x50] ss:$8 sps:$4 sm:$0xff]   ;;  %v1367_v28 = vld [vmem:[%s1633_s30 + $0x134] ss:$8 sps:$4 sm:$0xff]   ;;  %v1343_v29 = vld [vmem:[%s1633_s30 + $0x64] ss:$8 sps:$4 sm:$0xff]  }
  0x2e   : > { %607 = vmatprep.subr.bf16.mxu0 %v1331_v14  ;;  %v1369_v30 = vld [vmem:[%s1633_s30 + $0x130] ss:$8 sps:$4 sm:$0xff]   ;;  %v1345_v31 = vld [vmem:[%s1633_s30 + $0x60] ss:$8 sps:$4 sm:$0xff]   ;;  %v1373_v32 = vld [vmem:[%s1633_s30 + $0x144] ss:$8 sps:$4 sm:$0xff]  }
  0x2f   : > { %v1346_v33 = vld [vmem:[%s1633_s30 + $0x74] ss:$8 sps:$4 sm:$0xff]   ;;  %v1375_v34 = vld [vmem:[%s1633_s30 + $0x140] ss:$8 sps:$4 sm:$0xff]   ;;  %v1348_v35 = vld [vmem:[%s1633_s30 + $0x70] ss:$8 sps:$4 sm:$0xff]  }
  0x30   : > { %649 = vmatpush1.bf16.msra.mxu1 %v1357_v22  ;;  %v1379_v36 = vld [vmem:[%s1633_s30 + $0x154] ss:$8 sps:$4 sm:$0xff]   ;;  %v1352_v37 = vld [vmem:[%s1633_s30 + $0x84] ss:$8 sps:$4 sm:$0xff]   ;;  %v1354_v38 = vld [vmem:[%s1633_s30 + $0x80] ss:$8 sps:$4 sm:$0xff]  }
  0x31   : > { %608 = vmatpush1.bf16.msra.mxu0 %v1333_v15  ;;  %650 = vmatprep.subr.bf16.mxu1 %v1361_v25  ;;  %v1381_v39 = vld [vmem:[%s1633_s30 + $0x150] ss:$8 sps:$4 sm:$0xff]   ;;  %v1358_v40 = vld [vmem:[%s1633_s30 + $0x94] ss:$8 sps:$4 sm:$0xff]   ;;  %v1385_v41 = vld [vmem:[%s1633_s30 + $0x164] ss:$8 sps:$4 sm:$0xff]   ;;  %v742_v15 = vlaneseq }
  0x32   : > { %609 = vmatprep.subr.bf16.mxu0 %v1334_v16  ;;  %v1387_v42 = vld [vmem:[%s1633_s30 + $0x160] ss:$8 sps:$4 sm:$0xff]   ;;  %v1360_v43 = vld [vmem:[%s1633_s30 + $0x90] ss:$8 sps:$4 sm:$0xff]   ;;  %v1391_v44 = vld [vmem:[%s1633_s30 + $0x174] ss:$8 sps:$4 sm:$0xff]  }
  0x33   : > { %v1364_v45 = vld [vmem:[%s1633_s30 + $0xa4] ss:$8 sps:$4 sm:$0xff]   ;;  %v1393_v47 = vld [vmem:[%s1633_s30 + $0x170] ss:$8 sps:$4 sm:$0xff]   ;;  %v1366_v48 = vld [vmem:[%s1633_s30 + $0xa0] ss:$8 sps:$4 sm:$0xff]  }
  0x34   : > { %651 = vmatpush1.bf16.msra.mxu1 %v1363_v26  ;;  %v1400_v46 = vld [vmem:[%s1638_s21 + $0x4] ss:$12 sps:$4 sm:$0xff]   ;;  %v1370_v49 = vld [vmem:[%s1633_s30 + $0xb4] ss:$8 sps:$4 sm:$0xff]   ;;  %v1378_v53 = vld [vmem:[%s1633_s30 + $0xc0] ss:$8 sps:$4 sm:$0xff]  }
  0x35   : > { %610 = vmatpush1.bf16.msra.mxu0 %v1336_v17  ;;  %652 = vmatprep.subr.bf16.mxu1 %v1367_v28  ;;  %v1397_v50 = vld [vmem:[%s1638_s21 + $0x8] ss:$12 sps:$4 sm:$0xff]   ;;  %v1372_v51 = vld [vmem:[%s1633_s30 + $0xb0] ss:$8 sps:$4 sm:$0xff]   ;;  %v1376_v52 = vld [vmem:[%s1633_s30 + $0xc4] ss:$8 sps:$4 sm:$0xff]  }
  0x36   : > { %611 = vmatprep.subr.bf16.mxu0 %v1337_v20  ;;  %635 = vmatprep.mubr.bf16.mxu0 %v1400_v46  ;;  %v1382_v54 = vld [vmem:[%s1633_s30 + $0xd4] ss:$8 sps:$4 sm:$0xff]   ;;  %v1384_v55 = vld [vmem:[%s1633_s30 + $0xd0] ss:$8 sps:$4 sm:$0xff]   ;;  %v1388_v56 = vld [vmem:[%s1633_s30 + $0xe4] ss:$8 sps:$4 sm:$0xff]  }
  0x37   : > { %v1390_v57 = vld [vmem:[%s1633_s30 + $0xe0] ss:$8 sps:$4 sm:$0xff]   ;;  %v1394_v58 = vld [vmem:[%s1633_s30 + $0xf4] ss:$8 sps:$4 sm:$0xff]   ;;  %v1396_v59 = vld [vmem:[%s1633_s30 + $0xf0] ss:$8 sps:$4 sm:$0xff]  }
  0x38   : > { %653 = vmatpush1.bf16.msra.mxu1 %v1369_v30  ;;  %v1398_v60 = vld [vmem:[%s1638_s21] ss:$12 sps:$4 sm:$0xff]   ;;  %vm1523_vm0 = vmmov 0   ;;  %s1524_s18 = smov 64   ;;  %vm694_vm1 = vcmask 523264   ;;  %v743_v16 = vshrl.u32 %v742_v15, 7 }
  0x39   : > { %612 = vmatpush1.bf16.msra.mxu0 %v1339_v23  ;;  %654 = vmatprep.subr.bf16.mxu1 %v1373_v32  ;;  %v746_v17 = vand.u32 127, %v742_v15  ;;  %vm751_vm3 = vcmask 130048   ;;  %v1406_v46 = vld [vmem:[%s1643_s10 + $0x1c] ss:$12 sps:$4 sm:$0xff]   ;;  %s1247_s20 = smul.u32 768, %s1507_s19  ;;  %s1019_s21 = sshll.u32 %s1645_s8, 4  ;;  %s1760_s21 = int_to_ptr.vmem [resolvable:$true] %s1019_s21 }
  0x3a   : > { %613 = vmatprep.subr.bf16.mxu0 %v1340_v24  ;;  %v744_v18 = vadd.s32 8, %v743_v16  ;;  %s1834_s19 = sand.u32 1, %s1495_s16   ;;  %s1425_s11 = scalar_lea.vmem %s1760_s21, 768 }
  0x3b   : > { %vm747_vm2 = vcmp.le.s32.totalorder %v746_v17, %v743_v16  ;;  %s1758_s7 = scalar_lea.hbm %s1822_s4, %s1247_s20  ;;  %s1766_s9 = scalar_lea.sflag [#allocation3], %s1834_s19 }
  0x3c   : > { %655 = vmatpush1.bf16.msra.mxu1 %v1375_v34  ;;  %vm748_vm4 = vcmp.le.s32.totalorder %v746_v17, %v744_v18  ;;  %p1426_p2 = scmp.ne.s32.totalorder %s1760_s21, %s1425_s11  ;;  %s1525_s12 = smov [#allocation2]  }
  0x3d   : > { %614 = vmatpush1.bf16.msra.mxu0 %v1342_v27  ;;  %656 = vmatprep.subr.bf16.mxu1 %v1379_v36  ;;  %s1429_s13 = sshll.u32 %s1525_s12, 4  ;;  %s1430_s13 = int_to_ptr.vmem [resolvable:$false] %s1429_s13 }
  0x3e   : > { %615 = vmatprep.subr.bf16.mxu0 %v1343_v29  ;;  %p1427_p4 = pnand %p1426_p2, %p1602_p3  ;;  %s1431_s14 = scalar_lea.vmem %s1430_s13, 1536 }
  0x3f   : > { %p1432_p6 = scmp.lt.s32.totalorder %s1760_s21, %s1430_s13  ;;  %p1433_p7 = scmp.lt.s32.totalorder %s1431_s14, %s1425_s11 }
  0x40   : > { %657 = vmatpush1.bf16.msra.mxu1 %v1381_v39  ;;  %p1428_p5 = pneg %p1427_p4 }
  0x41   : > { %616 = vmatpush1.bf16.msra.mxu0 %v1345_v31  ;;  %658 = vmatprep.subr.bf16.mxu1 %v1385_v41  ;;  %p1434_p8 = por %p1433_p7, %p1432_p6 }
  0x42   : > { %617 = vmatprep.subr.bf16.mxu0 %v1346_v33 }
  0x43   : > { %p1435_p10 = pnand %p1434_p8, %p1428_p5 }
  0x44   : > { %659 = vmatpush1.bf16.msra.mxu1 %v1387_v42 }
  0x45   : > { %618 = vmatpush1.bf16.msra.mxu0 %v1348_v35  ;;  %660 = vmatprep.subr.bf16.mxu1 %v1391_v44  ;;  %v1401_v44 = vld [vmem:[%s1643_s10] ss:$12 sps:$4 sm:$0xff]  }
  0x46   : > { %619 = vmatprep.subr.bf16.mxu0 %v1352_v37  ;;  %v1403_v37 = vld [vmem:[%s1643_s10 + $0x4] ss:$12 sps:$4 sm:$0xff]  }
  0x48   : > { %661 = vmatpush1.bf16.msra.mxu1 %v1393_v47  ;;  %v1404_v47 = vld [vmem:[%s1643_s10 + $0x18] ss:$12 sps:$4 sm:$0xff]  }
  0x49   : > { %620 = vmatpush1.bf16.msra.mxu0 %v1354_v38  ;;  %1220 = vmatprep.subr.bf16.mxu1 %v1522_v61 }
  0x4a   : > { %621 = vmatprep.subr.bf16.mxu0 %v1358_v40 }
  0x4b   : > { %679 = vmatmul.mubr.bf16.vlgmr.msra.gmra.mrb[0].mxu1 %v1397_v50  ;;  %v1412_v50 = vld [vmem:[%s1643_s10 + $0x4c] ss:$12 sps:$4 sm:$0xff]  }
  0x4c   : > { %1222 = vmatprep.mubr.msk.bf16.mxu1 %vm1523_vm0, %v1522_v61 }
  0x4d   : > { %622 = vmatpush1.bf16.msra.mxu0 %v1360_v43 }
  0x4e   : > { %623 = vmatprep.subr.bf16.mxu0 %v1364_v45 }
  0x51   : > { %624 = vmatpush1.bf16.msra.mxu0 %v1366_v48  ;;  %v1409_v48 = vld [vmem:[%s1643_s10 + $0x34] ss:$12 sps:$4 sm:$0xff]  }
  0x52   : > { %625 = vmatprep.subr.bf16.mxu0 %v1370_v49  ;;  %v1407_v49 = vld [vmem:[%s1643_s10 + $0x30] ss:$12 sps:$4 sm:$0xff]  }
  0x55   : > { %626 = vmatpush1.bf16.msra.mxu0 %v1372_v51  ;;  %v1410_v51 = vld [vmem:[%s1643_s10 + $0x48] ss:$12 sps:$4 sm:$0xff]  }
  0x56   : > { %627 = vmatprep.subr.bf16.mxu0 %v1376_v52 }
  0x59   : > { %628 = vmatpush1.bf16.msra.mxu0 %v1378_v53 }
  0x5a   : > { %629 = vmatprep.subr.bf16.mxu0 %v1382_v54 }
  0x5d   : > { %630 = vmatpush1.bf16.msra.mxu0 %v1384_v55  ;;  %v1413_v55 = vld [vmem:[%s1643_s10 + $0x8] ss:$12 sps:$4 sm:$0xff]  }
  0x5e   : > { %631 = vmatprep.subr.bf16.mxu0 %v1388_v56 }
  0x61   : > { %632 = vmatpush1.bf16.msra.mxu0 %v1390_v57  ;;  %v1414_v57 = vld [vmem:[%s1643_s10 + $0x20] ss:$12 sps:$4 sm:$0xff]  }
  0x62   : > { %633 = vmatprep.subr.bf16.mxu0 %v1394_v58  ;;  %v1415_v58 = vld [vmem:[%s1643_s10 + $0x38] ss:$12 sps:$4 sm:$0xff]  }
  0x65   : > { %634 = vmatpush1.bf16.msra.mxu0 %v1396_v59  ;;  %v1416_v59 = vld [vmem:[%s1643_s10 + $0x50] ss:$12 sps:$4 sm:$0xff]  }
  0x66   : > { %1214 = vmatprep.subr.bf16.mxu0 %v1522_v61 }
  0x68   : > { %636 = vmatmul.mubr.bf16.vlgmr.msra.gmra.mrb[0].mxu0 %v1398_v60  ;;  %v819_v60 = vld [vmem:[%s1645_s8] sm:$0xff] }
  0x69   : > { %1216 = vmatprep.mubr.msk.bf16.mxu0 %vm1523_vm0, %v1522_v61 }
 0x11e   : > { %v680_v62 = vpop.f32.mrb[0].mxu1 }
 0x11f   : > { %v682_v63 = vpop.f32.mrb[1].mxu1 }
 0x120   : > { %v684_v0 = vpop.f32.mrb[2].mxu1 }
 0x121   : > { %v686_v1 = vpop.f32.mrb[3].mxu1 }
 0x13b   : > { %v637_v2 = vpop.f32.mrb[0].mxu0 }
 0x13c   : > { %v681_v3 = vadd.f32 %v680_v62, %v637_v2  ;;  %v639_v4 = vpop.f32.mrb[1].mxu0  ;;  %v820_v62 = vld [vmem:[%s1645_s8 + $0x8] sm:$0xff] }
 0x13d   : > { %v683_v5 = vadd.f32 %v682_v63, %v639_v4  ;;  %v641_v6 = vpop.f32.mrb[2].mxu0 }
 0x13e   : > { %v685_v7 = vadd.f32 %v684_v0, %v641_v6  ;;  %v643_v8 = vpop.f32.mrb[3].mxu0  ;;  %v822_v0 = vld [vmem:[%s1645_s8 + $0x18] sm:$0xff] }
 0x13f   : > { %v687_v9 = vadd.f32 %v686_v1, %v643_v8  ;;  %v821_v8 = vld [vmem:[%s1645_s8 + $0x10] sm:$0xff] }
 0x140   : > { %v689_v10 = vpack.c.bf16 %v685_v7, %v681_v3  ;;  %v823_v3 = vld [vmem:[%s1645_s8 + $0x20] sm:$0xff] }
 0x141   : > { %v690_v12 = vpack.c.bf16 %v687_v9, %v683_v5 }
 0x142   : > { %692 = vrot.lane.b32.xlu0 %v689_v10, %s1524_s18 }
 0x143   : > { %1221 = vmatpush3.bf16.msra.mxu1 %v690_v12 }
 0x144   : > { %909 = vmatprep.subr.bf16.mxu1 %v1403_v37 }
 0x1b4   : > { %v693_v13 = vpop.permute.xlu0 %692 }
 0x1b5   : > { %v699_v14 = vsel %vm694_vm1, %v693_v13, 0 }
 0x1b6   : > { %1215 = vmatpush3.bf16.xpose.msra.mxu0 %v699_v14 }
 0x1bd   : > { %1217 = vmatmul.mubr.msk.bf16.vlgmr.msra.gmra.mrb[4].mxu0 %vm694_vm1, %v689_v10  ;;  %v824_v10 = vld [vmem:[%s1645_s8 + $0x28] sm:$0xff] }
 0x290   : > { %v735_v19 = vpop.f32.mrb[4].mxu0 }
 0x291   : > { %v749_v20 = vsel %vm747_vm2, %v735_v19, -1e+30  ;;  %v1218_v21 = vpop.f32.mrb[5].mxu0 }
 0x292   : > { %v738_v22 = vpop.f32.mrb[6].mxu0  ;;  %v752_v23 = vsel %vm751_vm3, %v749_v20, -inf }
 0x293   : > { %v750_v24 = vsel %vm748_vm4, %v738_v22, -1e+30  ;;  %753 = vmax.xlane.f32.xlu0 %v752_v23  ;;  %v1219_v25 = vpop.f32.mrb[7].mxu0 }
 0x294   : > { %v755_v26 = vsel %vm751_vm3, %v750_v24, -inf }
 0x295   : > { %756 = vmax.xlane.f32.xlu1 %v755_v26 }
 0x320   : > { %v754_v27 = vpop.xlane.xlu0 %753 }
 0x321   : > { %v758_v28 = vsub.f32 %v749_v20, %v754_v27 }
 0x322   : > { %v757_v29 = vpop.xlane.xlu1 %756 }
 0x323   : > { %v760_v30 = vmul.f32 1.442695, %v758_v28  ;;  %v759_v31 = vsub.f32 %v750_v24, %v757_v29 }
 0x325   : > { %1417 = vpow2.f32 %v760_v30  ;;  %v762_v32 = vmul.f32 1.442695, %v759_v31 }
 0x327   : > { %1419 = vpow2.f32 %v762_v32 }
 0x32f   : > { %v1418_v33 = vpop.eup %1417 }
 0x330   : > { %v764_v34 = vsel %vm751_vm3, %v1418_v33, 0.0 }
 0x331   : > { %v1420_v35 = vpop.eup %1419  ;;  %765 = vadd.xlane.f32.xlu1 %v764_v34 }
 0x332   : > { %v767_v36 = vsel %vm751_vm3, %v1420_v35, 0.0 }
 0x335   : > { %768 = vadd.xlane.f32.xlu1 %v767_v36 }
 0x3be   : > { %v766_v38 = vpop.xlane.xlu1 %765 }
 0x3bf   : > { %1421 = vrcp.f32 %v766_v38 }
 0x3c2   : > { %v769_v39 = vpop.xlane.xlu1 %768 }
 0x3c3   : > { %1423 = vrcp.f32 %v769_v39 }
 0x3c9   : > { %v1422_v40 = vpop.eup %1421 }
 0x3ca   : > { %v772_v42 = vmul.f32 %v1422_v40, %v1418_v33 }
 0x3cd   : > { %v1424_v41 = vpop.eup %1423 }
 0x3ce   : > { %v773_v43 = vmul.f32 %v1424_v41, %v1420_v35 }
 0x3d0   : > { %v774_v45 = vpack.c.bf16 %v773_v43, %v772_v42 }
 0x3d2   : > { %1223 = vmatmul.mubr.msk.bf16.vlgmr.msra.gmra.mrb[4].mxu1 %vm751_vm3, %v774_v45 }
 0x3d3   : > { %910 = vmatpush1.bf16.msra.mxu1 %v1401_v44  ;;  %941 = vmatprep.mubr.bf16.mxu1 %v1521_v11 }
 0x3d4   : > { %911 = vmatprep.subr.bf16.mxu1 %v1406_v46 }
 0x3d7   : > { %912 = vmatpush1.bf16.msra.mxu1 %v1404_v47 }
 0x3d8   : > { %913 = vmatprep.subr.bf16.mxu1 %v1409_v48 }
 0x3db   : > { %914 = vmatpush1.bf16.msra.mxu1 %v1407_v49 }
 0x3dc   : > { %915 = vmatprep.subr.bf16.mxu1 %v1412_v50 }
 0x3df   : > { %916 = vmatpush1.bf16.msra.mxu1 %v1410_v51 }
 0x3e0   : > { %1226 = vmatprep.subr.bf16.mxu1 %v1522_v61 }
 0x4a5   : > { %v812_v52 = vpop.f32.mrb[4].mxu1 }
 0x4a6   : > { %v1224_v53 = vpop.f32.mrb[5].mxu1 }
 0x4a7   : > { %v815_v54 = vpop.f32.mrb[6].mxu1 }
 0x4a8   : > { %v825_v11 = vpack.c.bf16 %v815_v54, %v812_v52  ;;  %v1225_v56 = vpop.f32.mrb[7].mxu1 }
 0x4aa   : > { %1200 = vmatmul.mubr.msk.bf16.vlgmr.msra.gmra.mrb[8].mxu1 %vm694_vm1, %v825_v11 }
 0x4ab   : > { %1227 = vmatpush3.bf16.msra.mxu1 %v1413_v55  ;;  %1234 = vmatprep.mubr.msk.bf16.mxu1 %vm1523_vm0, %v1522_v61 }
 0x4ac   : > { %1228 = vmatprep.subr.bf16.mxu1 %v1522_v61 }
 0x4af   : > { %1229 = vmatpush3.bf16.msra.mxu1 %v1414_v57 }
 0x4b0   : > { %1230 = vmatprep.subr.bf16.mxu1 %v1522_v61 }
 0x4b3   : > { %1231 = vmatpush3.bf16.msra.mxu1 %v1415_v58 }
 0x4b4   : > { %1232 = vmatprep.subr.bf16.mxu1 %v1522_v61 }
 0x4b7   : > { %1233 = vmatpush3.bf16.msra.mxu1 %v1416_v59 }
 0x4ba   : > { %1235 = vmatmul.mubr.msk.bf16.vlgmr.msra.gmra.mrb[12].mxu1 %vm694_vm1, %v825_v11 }
 0x57d   : > { %v943_v63 = vpop.f32.mrb[8].mxu1 }
 0x57e   : > { %v993_v1 = vadd.f32 %v943_v63, %v819_v60  ;;  %v945_v2 = vpop.f32.mrb[9].mxu1 }
 0x57f   : > { %v994_v4 = vadd.f32 %v945_v2, %v820_v62  ;;  %v947_v5 = vpop.f32.mrb[10].mxu1 }
 0x580   : > { %999 = vst [vmem:[%s1645_s8] sm:$0xff] %v993_v1  ;;  %v996_v61 = vadd.f32 %v947_v5, %v822_v0  ;;  %v949_v6 = vpop.f32.mrb[11].mxu1 }
 0x581   : > { %1000 = vst [vmem:[%s1645_s8 + $0x8] sm:$0xff] %v994_v4  ;;  %v997_v7 = vadd.f32 %v949_v6, %v823_v3 }
 0x582   : > { %1002 = vst [vmem:[%s1645_s8 + $0x18] sm:$0xff] %v996_v61 }
 0x583   : > { %1003 = vst [vmem:[%s1645_s8 + $0x20] sm:$0xff] %v997_v7 }
 0x58d   : > { %v986_v9 = vpop.f32.mrb[12].mxu1 }
 0x58e   : > { %v995_v12 = vadd.f32 %v986_v9, %v821_v8  ;;  %v1236_v13 = vpop.f32.mrb[13].mxu1 }
 0x58f   : > { %v989_v14 = vpop.f32.mrb[14].mxu1 }
 0x590   : > { %1001 = vst [vmem:[%s1645_s8 + $0x10] sm:$0xff] %v995_v12  ;;  %v998_v15 = vadd.f32 %v989_v14, %v824_v10  ;;  %v1237_v16 = vpop.f32.mrb[15].mxu1 }
 0x592   : > { %1004 = vst [vmem:[%s1645_s8 + $0x28] sm:$0xff] %v998_v15 }
 0x593   : > { %1438 = shalt.err (!%p1435_p10)
}
 0x594   : > { %s1439_s23 = scalar_lea.hbm %s1758_s7, 768  ;;  %s1443_s30 = scalar_lea.hbm %s1822_s4, 1536 }
 0x595   : > { %p1440_p11 = scmp.ne.s32.totalorder %s1758_s7, %s1439_s23  ;;  %p1444_p0 = scmp.lt.u32.totalorder %s1758_s7, %s1822_s4 }
 0x596   : > { %p1445_p1 = scmp.lt.u32.totalorder %s1443_s30, %s1439_s23  ;;  %p1447_p4 = scmp.lt.u32.totalorder %s1439_s23, %s1758_s7 }
 0x597   : > { %p1441_p12 = pnand %p1440_p11, %p1602_p3 }
 0x598   : > { %p1446_p2 = por %p1445_p1, %p1444_p0 }
 0x599   : > { %p1442_p13 = pneg %p1441_p12 }
 0x59a   : > { %p1448_p5 = por %p1447_p4, %p1446_p2 }
 0x59c   : > { %p1449_p6 = pnand %p1448_p5, %p1442_p13 }
 0x59e   : > { %1452 = shalt.err (!%p1449_p6)
}
 0x59f   : > { %s1526_s25 = smov 384   ;;  %s1527_s26 = smov 24  }
 0x5a0   : > { %1248 = dma.vmem_to_hbm [thread:$0]  (%p1602_p3), %s1760_s21, 768, %s1758_s7, %s1766_s9, %s1526_s25, %s1526_s25, %s1527_s26  }
 0x5a1 PF: > { %p1254_p7 = scmp.ge.s32.totalorder %s1519_s22, 2  ;;  %s1034_s18 = sand.u32 1, %s1491_s15  }
 0x5a2   : > { %s1035_s20 = scalar_lea.sflag [#allocation3], %s1034_s18 }
 0x5a3   : > { %p1251_p8 = pnand %p1254_p7, %p1612_p9 }
 0x5a5   : > { %1486 = dma.done.wait (!%p1251_p8), %s1035_s20, 768  }
 0x5a6   : > { %1488 = vsyncadd (!%p1251_p8), %s1035_s20, 4294966528  ;;  %s17_s22 = sadd.s32 1, %s1519_s22   ;;  %s1835_s5 = sld [smem:[#allocation9_spill]] }
 0x5a7   : > { %p14_p10 = scmp.ge.s32.totalorder %s17_s22, 14   ;;  %s1836_s18 = sld [smem:[#allocation5_spill]] }
 0x5a8   : > { %s1837_s19 = sld [smem:[#allocation6_spill]]  ;;  %s1838_s20 = sld [smem:[#allocation7_spill]] }
 0x5a9   : > { %s1839_s21 = sld [smem:[#allocation8_spill]]  ;;  %s1840_s15 = smov %s1495_s16 }
 0x5aa   : > { %s1841_s16 = smov %s1499_s17  ;;  %16 = sbr.rel (!%p14_p10) target bundleno = 5 (0x5), region = 81 }
 0x5ac   : > { %s1842_s17 = smov %s1835_s5 }
 0x5b1   :  { %1040 = vsyncpa [#allocation3], 1 }
 0x5b2   :  { %1042 = vsyncpa [#allocation3 + $0x1], 1 }

</bundles_post_ra>
